<compile_context>
chip_gen: v7x
topology: tpu7x:2x2x1
jax: 0.10.0
libtpu: 0.0.40
codegen_flags: <defaults>
</compile_context>

<pallas_src>
import functools

import jax
import jax.numpy as jnp
from jax.experimental import pallas as pl
from jax.experimental.pallas import tpu as pltpu


# ---------------------------------------------------------------------------
# VMEM budgeting
# ---------------------------------------------------------------------------
def _vmem_limit_bytes():
    """Scoped-VMEM limit to request, derived from physical VMEM capacity."""
    try:
        cap = int(pltpu.get_tpu_info().vmem_capacity_bytes)
    except Exception:
        cap = 64 << 20          # conservative fallback (v7x: 64 MiB / TensorCore)
    # Leave headroom for Mosaic internal scratch / semaphores.
    return max(32 << 20, (cap * 3) // 4)


def _pick_hw_tile(C, HW, itemsize, target_bytes):
    """Lane tile for the flattened H*W axis (two-pass fallback).

    Multiple of 128 (or the full HW when small), sized so one (1, C, hw_tile)
    block is ~2-4 MiB: big enough to sit near the HBM roofline, small enough
    that double-buffered in+out blocks fit comfortably in scoped VMEM.
    """
    if C * HW * itemsize <= target_bytes or HW <= 1024:
        return HW
    t = (target_bytes // max(C * itemsize, 1)) // 128 * 128
    t = max(t, 128)
    t = min(t, (HW // 128) * 128)
    return int(t)


def _sigmoid(z):
    # Written explicitly so lowering is guaranteed (exp goes to the EUP).
    return 1.0 / (1.0 + jnp.exp(-z))


# ---------------------------------------------------------------------------
# Fused single-pass kernel: pool + gate + scale on a resident slab
# ---------------------------------------------------------------------------
def _fused_kernel(x_ref, w1t_ref, b1_ref, w2t_ref, b2_ref, o_ref, *, inv_hw):
    x = x_ref[...]                                              # (TN, C, HW)
    pooled = jnp.sum(x.astype(jnp.float32), axis=-1) * inv_hw   # (TN, C) f32
    # Tiny gate (f32, off the memory-bound critical slot): VPU mul + reduce.
    h = jnp.sum(pooled[:, :, None] * w1t_ref[...][None, :, :], axis=1)
    h = jnp.maximum(h + b1_ref[...], 0.0)                       # (TN, S)  ReLU
    g = jnp.sum(h[:, :, None] * w2t_ref[...][None, :, :], axis=1)
    g = _sigmoid(g + b2_ref[...])                               # (TN, C)
    # Scale from the resident copy; multiply in x's dtype (gate cast once).
    o_ref[...] = x * g[:, :, None].astype(x.dtype)


# ---------------------------------------------------------------------------
# Two-pass fallback
# ---------------------------------------------------------------------------
def _pool_gate_kernel(x_ref, w1t_ref, b1_ref, w2t_ref, b2_ref, g_ref,
                      *, hw_total, hw_tile):
    # x_ref: (1, C, hw_tile).  g_ref: (1, C, 1) f32, resident across the HW
    # axis; used as the sum accumulator and overwritten with the gate at the
    # last HW tile (C stays on sublanes -> no per-step relayout).
    h_idx = pl.program_id(1)
    last = pl.num_programs(1) - 1

    @pl.when(h_idx == 0)
    def _():
        g_ref[...] = jnp.zeros_like(g_ref)

    x = x_ref[...].astype(jnp.float32)                          # (1, C, hw_tile)

    if hw_total % hw_tile != 0:
        # Mask only the partial last tile; unmasked accumulate otherwise.
        @pl.when(h_idx != last)
        def _():
            g_ref[...] += jnp.sum(x, axis=-1, keepdims=True)

        @pl.when(h_idx == last)
        def _():
            lane = jax.lax.broadcasted_iota(jnp.int32, x.shape, 2)
            xm = jnp.where(h_idx * hw_tile + lane < hw_total, x, 0.0)
            g_ref[...] += jnp.sum(xm, axis=-1, keepdims=True)
    else:
        g_ref[...] += jnp.sum(x, axis=-1, keepdims=True)

    @pl.when(h_idx == last)
    def _():
        # Finalize: 1/HW scale + both 1x1 convs + ReLU + sigmoid, in-kernel,
        # emitting the gate directly (no XLA round trip between passes).
        pooled = g_ref[...][:, :, 0] * jnp.float32(1.0 / hw_total)      # (1, C)
        hmid = jnp.sum(pooled[:, :, None] * w1t_ref[...][None, :, :], axis=1)
        hmid = jnp.maximum(hmid + b1_ref[...], 0.0)                     # (1, S)
        gate = jnp.sum(hmid[:, :, None] * w2t_ref[...][None, :, :], axis=1)
        g_ref[...] = _sigmoid(gate + b2_ref[...])[:, :, None]           # (1, C, 1)


def _scale_kernel(x_ref, g_ref, o_ref):
    # x_ref/o_ref: (1, C, hw_tile).  g_ref: (1, C, 1) f32.
    # Multiply in x's dtype; gate cast once per block (noop for f32 inputs).
    o_ref[...] = x_ref[...] * g_ref[...].astype(o_ref.dtype)


# ---------------------------------------------------------------------------
# Wrapper
# ---------------------------------------------------------------------------
def squeeze_excitation(x, w1, b1, w2, b2, *, force_two_pass=False):
    """x: (N, C, H, W). w1: (S, C), b1: (S,), w2: (C, S), b2: (C,)."""
    N, C, H, W = x.shape
    S = w1.shape[0]
    HW = H * W
    itemsize = jnp.dtype(x.dtype).itemsize
    x2 = x.reshape(N, C, HW)

    # Gate parameters: pre-transposed, f32, 2-D biases (tiny, resident in VMEM).
    w1t = w1.astype(jnp.float32).T            # (C, S)
    b1r = b1.astype(jnp.float32).reshape(1, S)
    w2t = w2.astype(jnp.float32).T            # (S, C)
    b2r = b2.astype(jnp.float32).reshape(1, C)

    vmem_limit = _vmem_limit_bytes()

    def cparams(sem):
        return pltpu.CompilerParams(dimension_semantics=sem,
                                    vmem_limit_bytes=vmem_limit)

    slab = C * HW * itemsize
    fused_budget = vmem_limit // 5    # 2 in + 2 out buffers + weights + headroom

    if slab <= fused_budget and not force_two_pass:
        # Pack as many whole batch elements per grid step as fit (divisor of N
        # so there are no partial batch blocks).
        tn = 1
        for d in range(1, N + 1):
            if N % d == 0 and d * slab <= fused_budget:
                tn = d
        # TODO(synk): on v7x with N // tn == 1 only one TensorCore is used.
        out = pl.pallas_call(
            functools.partial(_fused_kernel, inv_hw=float(1.0 / HW)),
            out_shape=jax.ShapeDtypeStruct((N, C, HW), x.dtype),
            grid_spec=pltpu.PrefetchScalarGridSpec(
                num_scalar_prefetch=0,
                grid=(N // tn,),
                in_specs=[
                    pl.BlockSpec((tn, C, HW), lambda i: (i, 0, 0)),
                    pl.BlockSpec((C, S), lambda i: (0, 0)),
                    pl.BlockSpec((1, S), lambda i: (0, 0)),
                    pl.BlockSpec((S, C), lambda i: (0, 0)),
                    pl.BlockSpec((1, C), lambda i: (0, 0)),
                ],
                out_specs=pl.BlockSpec((tn, C, HW), lambda i: (i, 0, 0)),
            ),
            compiler_params=cparams(("parallel",)),
        )(x2, w1t, b1r, w2t, b2r)
        return out.reshape(N, C, H, W)

    # ---- Two-pass fallback: per-image slab too large to hold resident ----
    hw_tile = _pick_hw_tile(C, HW, itemsize,
                            target_bytes=min(4 << 20, vmem_limit // 8))
    n_hw = pl.cdiv(HW, hw_tile)

    # Pass 1: tiled global sum + in-kernel gate finalize -> g: (N, C, 1) f32.
    # TODO(synk): on v7x the only "parallel" axis here is N; if N is small the
    # second TensorCore idles during the pool pass.
    g = pl.pallas_call(
        functools.partial(_pool_gate_kernel, hw_total=HW, hw_tile=hw_tile),
        out_shape=jax.ShapeDtypeStruct((N, C, 1), jnp.float32),
        grid_spec=pltpu.PrefetchScalarGridSpec(
            num_scalar_prefetch=0,
            grid=(N, n_hw),
            in_specs=[
                pl.BlockSpec((1, C, hw_tile), lambda n, h: (n, 0, h)),
                pl.BlockSpec((C, S), lambda n, h: (0, 0)),
                pl.BlockSpec((1, S), lambda n, h: (0, 0)),
                pl.BlockSpec((S, C), lambda n, h: (0, 0)),
                pl.BlockSpec((1, C), lambda n, h: (0, 0)),
            ],
            out_specs=pl.BlockSpec((1, C, 1), lambda n, h: (n, 0, 0)),
        ),
        compiler_params=cparams(("parallel", "arbitrary")),
    )(x2, w1t, b1r, w2t, b2r)

    # Pass 2: streaming scale out = x * g (memory-bound part).
    out = pl.pallas_call(
        _scale_kernel,
        out_shape=jax.ShapeDtypeStruct((N, C, HW), x.dtype),
        grid_spec=pltpu.PrefetchScalarGridSpec(
            num_scalar_prefetch=0,
            grid=(N, n_hw),
            in_specs=[
                pl.BlockSpec((1, C, hw_tile), lambda n, h: (n, 0, h)),
                pl.BlockSpec((1, C, 1), lambda n, h: (n, 0, 0)),
            ],
            out_specs=pl.BlockSpec((1, C, hw_tile), lambda n, h: (n, 0, h)),
        ),
        compiler_params=cparams(("parallel", "parallel")),
    )(x2, g)
    return out.reshape(N, C, H, W)


# ---------------------------------------------------------------------------
# Reference & smoke test
# ---------------------------------------------------------------------------
def _reference(x, w1, b1, w2, b2):
    pooled = jnp.mean(x, axis=(2, 3))                       # (N, C)
    h = jnp.maximum(pooled @ w1.T + b1, 0.0)                # (N, S)
    g = jax.nn.sigmoid(h @ w2.T + b2)                       # (N, C)
    return x * g[:, :, None, None]


if __name__ == "__main__":
    N, C, S, H, W = 2, 4, 8, 16, 16

    key = jax.random.PRNGKey(0)
    kx, k1, k2, k3, k4 = jax.random.split(key, 5)
    x = jax.random.normal(kx, (N, C, H, W), dtype=jnp.float32)

    # 1x1 conv weights squeezed to matrices.
    w1 = jax.random.normal(k1, (S, C), dtype=jnp.float32) * 0.1   # in -> squeeze
    b1 = jax.random.normal(k2, (S,), dtype=jnp.float32) * 0.1
    w2 = jax.random.normal(k3, (C, S), dtype=jnp.float32) * 0.1   # squeeze -> in
    b2 = jax.random.normal(k4, (C,), dtype=jnp.float32) * 0.1

    ref = _reference(x, w1, b1, w2, b2)

    # Primary fused path.
    out_fused = jax.block_until_ready(squeeze_excitation(x, w1, b1, w2, b2))
    # Exercise the two-pass fallback path as well (used for very large slabs).
    out_2pass = jax.block_until_ready(
        squeeze_excitation(x, w1, b1, w2, b2, force_two_pass=True))

    assert out_fused.shape == (N, C, H, W)
    assert jnp.allclose(out_fused, ref, atol=1e-5, rtol=1e-5)
    assert jnp.allclose(out_2pass, ref, atol=1e-5, rtol=1e-5)

    print("KERNEL_OK")
</pallas_src>

<mosaic_0001>
module attributes {stable_mosaic.version = 11 : i64} {
  func.func @_fused_kernel(%arg0: i32, %arg1: memref<2x4x256xf32, #tpu.memory_space<vmem>>, %arg2: memref<4x8xf32, #tpu.memory_space<vmem>>, %arg3: memref<1x8xf32, #tpu.memory_space<vmem>>, %arg4: memref<8x4xf32, #tpu.memory_space<vmem>>, %arg5: memref<1x4xf32, #tpu.memory_space<vmem>>, %arg6: memref<2x4x256xf32, #tpu.memory_space<vmem>>) attributes {dimension_semantics = [#tpu.dimension_semantics<parallel>], iteration_bounds = array<i64: 1>, scalar_prefetch = 0 : i64, scratch_operands = 0 : i64, tpu.core_type = #tpu.core_type<tc>, window_params = [{transform_indices = @transform_0, window_bounds = array<i64: 2, 4, 256>}, {pipeline_mode = #tpu.pipeline_mode<synchronous>, transform_indices = @transform_1, window_bounds = array<i64: 4, 8>}, {pipeline_mode = #tpu.pipeline_mode<synchronous>, transform_indices = @transform_2, window_bounds = array<i64: 1, 8>}, {pipeline_mode = #tpu.pipeline_mode<synchronous>, transform_indices = @transform_3, window_bounds = array<i64: 8, 4>}, {pipeline_mode = #tpu.pipeline_mode<synchronous>, transform_indices = @transform_4, window_bounds = array<i64: 1, 4>}, {transform_indices = @transform_5, window_bounds = array<i64: 2, 4, 256>}]} {
    %c0 = arith.constant 0 : index
    %c0_0 = arith.constant 0 : index
    %c0_1 = arith.constant 0 : index
    %0 = vector.load %arg1[%c0, %c0_0, %c0_1] : memref<2x4x256xf32, #tpu.memory_space<vmem>>, vector<2x4x256xf32>
    %cst = arith.constant dense<0.000000e+00> : vector<2x4xf32>
    %1 = vector.multi_reduction <add>, %0, %cst [2] : vector<2x4x256xf32> to vector<2x4xf32>
    %cst_2 = arith.constant 3.906250e-03 : f32
    %2 = vector.broadcast %cst_2 : f32 to vector<2x4xf32>
    %3 = arith.mulf %1, %2 : vector<2x4xf32>
    %4 = vector.shape_cast %3 : vector<2x4xf32> to vector<2x4x1xf32>
    %c0_3 = arith.constant 0 : index
    %c0_4 = arith.constant 0 : index
    %5 = vector.load %arg2[%c0_3, %c0_4] : memref<4x8xf32, #tpu.memory_space<vmem>>, vector<4x8xf32>
    %6 = vector.shape_cast %5 : vector<4x8xf32> to vector<1x4x8xf32>
    %7 = vector.broadcast %4 : vector<2x4x1xf32> to vector<2x4x8xf32>
    %8 = vector.broadcast %6 : vector<1x4x8xf32> to vector<2x4x8xf32>
    %9 = arith.mulf %7, %8 : vector<2x4x8xf32>
    %cst_5 = arith.constant dense<0.000000e+00> : vector<2x8xf32>
    %10 = vector.multi_reduction <add>, %9, %cst_5 [1] : vector<2x4x8xf32> to vector<2x8xf32>
    %c0_6 = arith.constant 0 : index
    %c0_7 = arith.constant 0 : index
    %11 = vector.load %arg3[%c0_6, %c0_7] : memref<1x8xf32, #tpu.memory_space<vmem>>, vector<1x8xf32>
    %12 = vector.broadcast %11 : vector<1x8xf32> to vector<2x8xf32>
    %13 = arith.addf %10, %12 : vector<2x8xf32>
    %cst_8 = arith.constant 0.000000e+00 : f32
    %14 = vector.broadcast %cst_8 : f32 to vector<2x8xf32>
    %15 = arith.maximumf %13, %14 : vector<2x8xf32>
    %16 = vector.shape_cast %15 : vector<2x8xf32> to vector<2x8x1xf32>
    %c0_9 = arith.constant 0 : index
    %c0_10 = arith.constant 0 : index
    %17 = vector.load %arg4[%c0_9, %c0_10] : memref<8x4xf32, #tpu.memory_space<vmem>>, vector<8x4xf32>
    %18 = vector.shape_cast %17 : vector<8x4xf32> to vector<1x8x4xf32>
    %19 = vector.broadcast %16 : vector<2x8x1xf32> to vector<2x8x4xf32>
    %20 = vector.broadcast %18 : vector<1x8x4xf32> to vector<2x8x4xf32>
    %21 = arith.mulf %19, %20 : vector<2x8x4xf32>
    %cst_11 = arith.constant dense<0.000000e+00> : vector<2x4xf32>
    %22 = vector.multi_reduction <add>, %21, %cst_11 [1] : vector<2x8x4xf32> to vector<2x4xf32>
    %c0_12 = arith.constant 0 : index
    %c0_13 = arith.constant 0 : index
    %23 = vector.load %arg5[%c0_12, %c0_13] : memref<1x4xf32, #tpu.memory_space<vmem>>, vector<1x4xf32>
    %24 = vector.broadcast %23 : vector<1x4xf32> to vector<2x4xf32>
    %25 = arith.addf %22, %24 : vector<2x4xf32>
    %cst_14 = arith.constant 0.000000e+00 : f32
    %26 = vector.broadcast %cst_14 : f32 to vector<2x4xf32>
    %27 = arith.subf %26, %25 : vector<2x4xf32>
    %28 = math.exp %27 : vector<2x4xf32>
    %cst_15 = arith.constant 1.000000e+00 : f32
    %29 = vector.broadcast %cst_15 : f32 to vector<2x4xf32>
    %30 = arith.addf %29, %28 : vector<2x4xf32>
    %cst_16 = arith.constant 1.000000e+00 : f32
    %31 = vector.broadcast %cst_16 : f32 to vector<2x4xf32>
    %32 = arith.divf %31, %30 : vector<2x4xf32>
    %33 = vector.shape_cast %32 : vector<2x4xf32> to vector<2x4x1xf32>
    %34 = vector.broadcast %33 : vector<2x4x1xf32> to vector<2x4x256xf32>
    %35 = arith.mulf %0, %34 : vector<2x4x256xf32>
    %c0_17 = arith.constant 0 : index
    %c0_18 = arith.constant 0 : index
    %c0_19 = arith.constant 0 : index
    %36 = vector.load %arg6[%c0_17, %c0_18, %c0_19] : memref<2x4x256xf32, #tpu.memory_space<vmem>>, vector<2x4x256xf32>
    tpu.vector_store %arg6[%c0_17, %c0_18, %c0_19], %35 {strides = array<i32>} : memref<2x4x256xf32, #tpu.memory_space<vmem>>, vector<2x4x256xf32>,
    return
  }
  func.func @transform_0(%arg0: i32) -> (i32, i32, i32) {
    %c0_i32 = arith.constant 0 : i32
    %c0_i32_0 = arith.constant 0 : i32
    %c0_i32_1 = arith.constant 0 : i32
    return %arg0, %c0_i32, %c0_i32_0 : i32, i32, i32
  }
  func.func @transform_1(%arg0: i32) -> (i32, i32) {
    %c0_i32 = arith.constant 0 : i32
    %c0_i32_0 = arith.constant 0 : i32
    %c0_i32_1 = arith.constant 0 : i32
    return %c0_i32, %c0_i32_0 : i32, i32
  }
  func.func @transform_2(%arg0: i32) -> (i32, i32) {
    %c0_i32 = arith.constant 0 : i32
    %c0_i32_0 = arith.constant 0 : i32
    %c0_i32_1 = arith.constant 0 : i32
    return %c0_i32, %c0_i32_0 : i32, i32
  }
  func.func @transform_3(%arg0: i32) -> (i32, i32) {
    %c0_i32 = arith.constant 0 : i32
    %c0_i32_0 = arith.constant 0 : i32
    %c0_i32_1 = arith.constant 0 : i32
    return %c0_i32, %c0_i32_0 : i32, i32
  }
  func.func @transform_4(%arg0: i32) -> (i32, i32) {
    %c0_i32 = arith.constant 0 : i32
    %c0_i32_0 = arith.constant 0 : i32
    %c0_i32_1 = arith.constant 0 : i32
    return %c0_i32, %c0_i32_0 : i32, i32
  }
  func.func @transform_5(%arg0: i32) -> (i32, i32, i32) {
    %c0_i32 = arith.constant 0 : i32
    %c0_i32_0 = arith.constant 0 : i32
    %c0_i32_1 = arith.constant 0 : i32
    return %arg0, %c0_i32, %c0_i32_0 : i32, i32, i32
  }
}

</mosaic_0001>

<bundles_post_ra>
// kernel: tpu_custom_call.1
= control target key start
LH: loop header
LB: loop body
LE: loop exit
PB: predicated region body
PF: predicated region fallthrough
CT: control target
= control target key end

     0   :  { %10 = vsyncpa [#allocation3], 0  ;;  %s345_s0 = inlined_call_operand.hbm [shape: f32[2,4,256], index: 0, kind: input, shape index: {}]   ;;  %s346_s1 = inlined_call_operand.vmem [shape: f32[4,8], index: 1, kind: input, shape index: {}]   ;;  %s347_s2 = inlined_call_operand.vmem [shape: f32[1,8], index: 2, kind: input, shape index: {}]   ;;  %s348_s3 = inlined_call_operand.vmem [shape: f32[8,4], index: 3, kind: input, shape index: {}]   ;;  %s349_s4 = inlined_call_operand.vmem [shape: f32[1,4], index: 4, kind: input, shape index: {}]   ;;  %s350_s5 = inlined_call_operand.hbm [shape: f32[2,4,256], index: 5, kind: output, shape index: {}]  }
   0x1   :  { %11 = vsyncpa [#allocation4], 0  ;;  %s256_s18 = smov [#allocation2]   ;;  %s208_s22 = scalar_lea.hbm %s345_s0, 256 }
   0x2   :  { %s17_s19 = sshll.u32 %s256_s18, 4  ;;  %p209_p0 = scmp.ne.s32.totalorder %s345_s0, %s208_s22  ;;  %s18_s19 = int_to_ptr.vmem [resolvable:$true] %s17_s19 }
   0x3   :  { %p212_p1 = scmp.lt.u32.totalorder %s208_s22, %s345_s0 }
   0x5   :  { %p214_p2 = pnand %p212_p1, %p209_p0 }
   0x7   :  { %217 = shalt.err (!%p214_p2)
}
   0x8   :  { %s218_s27 = scalar_lea.vmem %s18_s19, 256  ;;  %p223_p4 = scmp.lt.s32.totalorder %s18_s19, %s18_s19 }
   0x9   :  { %p219_p3 = scmp.ne.s32.totalorder %s18_s19, %s218_s27  ;;  %p224_p5 = scmp.lt.s32.totalorder %s218_s27, %s218_s27 }
   0xb   :  { %p225_p6 = por %p224_p5, %p223_p4 }
   0xd   :  { %p226_p7 = pnand %p225_p6, %p219_p3 }
   0xf   :  { %229 = shalt.err (!%p226_p7)
}
  0x10   :  { %s257_s28 = smov 128   ;;  %s258_s29 = smov 8  }
  0x11   :  { %23 = dma.hbm_to_vmem [thread:$0]  %s345_s0, 256, %s18_s19, [#allocation3], %s257_s28, %s257_s28, %s258_s29  }
  0x12   :  { %252 = dma.done.wait [#allocation3], 256  }
  0x13   :  { %253 = vsyncadd [#allocation3], 4294967040  ;;  %vm43_vm0 = vcmask 1043456   ;;  %v306_v0 = vld [vmem:[#allocation2] sm:$0xff]  ;;  %v308_v1 = vld [vmem:[#allocation2 + $0x8] sm:$0xff]  ;;  %vm59_vm1 = vcmask 60416   ;;  %v85_v23 = vlaneseq }
  0x14   :  { %v39_v2 = vcombine.high %v306_v0, %v306_v0  ;;  %v44_v3 = vsel %vm43_vm0, %v306_v0, 0.0  ;;  %v40_v4 = vcombine.high %v308_v1, %v308_v1  ;;  %v49_v6 = vsel %vm43_vm0, %v308_v1, 0.0  ;;  %v56_v10 = vld [vmem:[%s346_s1] sm:$0xf] }
  0x15   :  { %v86_v28 = vshrl.u32 %v85_v23, 7  ;;  %v191_v29 = vld [vmem:[%s347_s2] ss:$0 sm:$0xff]  ;;  %vm102_vm2 = vcmask 31744  }
  0x16   :  { %v45_v5 = vsel %vm43_vm0, %v39_v2, 0.0  ;;  %v50_v7 = vsel %vm43_vm0, %v40_v4, 0.0  ;;  %v99_v41 = vld [vmem:[%s348_s3] sm:$0xff]  ;;  %s260_s3 = smov [#allocation5]  }
  0x17   :  { %v46_v8 = vadd.f32 %v45_v5, %v44_v3  ;;  %v51_v9 = vadd.f32 %v50_v7, %v49_v6  ;;  %v87_v33 = vsub.s32 0, %v86_v28  ;;  %v192_v56 = vld [vmem:[%s349_s4] ss:$0 sm:$0xff]  ;;  %s179_s4 = sshll.u32 %s260_s3, 4  ;;  %s180_s4 = int_to_ptr.vmem [resolvable:$true] %s179_s4 }
  0x18   :  { %s230_s12 = scalar_lea.vmem %s180_s4, 256  ;;  %p235_p9 = scmp.lt.s32.totalorder %s180_s4, %s180_s4 }
  0x19   :  { %47 = vadd.xlane.f32.xlu0 %v46_v8  ;;  %p231_p8 = scmp.ne.s32.totalorder %s180_s4, %s230_s12  ;;  %p236_p10 = scmp.lt.s32.totalorder %s230_s12, %s230_s12 }
  0x1b   :  { %p237_p11 = por %p236_p10, %p235_p9 }
  0x1d   :  { %52 = vadd.xlane.f32.xlu0 %v51_v9  ;;  %p238_p12 = pnand %p237_p11, %p231_p8 }
  0xa6   :  { %v48_v11 = vpop.xlane.xlu0 %47 }
  0xa7   :  { %v54_v12 = vmul.f32 0.00390625, %v48_v11 }
  0xa9   :  { %v57_v13 = vmul.f32 %v56_v10, %v54_v12 }
  0xaa   :  { %v53_v14 = vpop.xlane.xlu0 %52 }
  0xab   :  { %v60_v15 = vsel %vm59_vm1, %v57_v13, 0.0  ;;  %v55_v16 = vmul.f32 0.00390625, %v53_v14  ;;  %v259_v13 = vmov 839922192  }
  0xac   :  { %v61_v17 = vrot.slane %v60_v15, 4  ;;  %v155_v14 = vunpack.c.l.s4 %v259_v13 }
  0xad   :  { %v58_v18 = vmul.f32 %v56_v10, %v55_v16 }
  0xae   :  { %v62_v19 = vadd.f32 %v61_v17, %v60_v15  ;;  %v156_v15 = vunpack.c.0.s8 %v155_v14 }
  0xaf   :  { %v67_v20 = vsel %vm59_vm1, %v58_v18, 0.0 }
  0xb0   :  { %v63_v21 = vrot.slane %v62_v19, 2  ;;  %v68_v22 = vrot.slane %v67_v20, 4  ;;  %v159_v16 = vsub.s32 %v156_v15, %v86_v28 }
  0xb2   :  { %v69_v24 = vadd.f32 %v68_v22, %v67_v20  ;;  %v64_v25 = vadd.f32 %v63_v21, %v62_v19 }
  0xb4   :  { %v70_v26 = vrot.slane %v69_v24, 2  ;;  %v65_v27 = vrot.slane %v64_v25, 1 }
  0xb6   :  { %v71_v30 = vadd.f32 %v70_v26, %v69_v24  ;;  %v66_v31 = vadd.f32 %v65_v27, %v64_v25 }
  0xb8   :  { %v81_v32 = vadd.f32 %v191_v29, %v66_v31  ;;  %v72_v34 = vrot.slane %v71_v30, 1 }
  0xba   :  { %v83_v35 = vmax.f32 %v81_v32, 0.0  ;;  %v73_v36 = vadd.f32 %v72_v34, %v71_v30 }
  0xbc   :  { %v88_v37 = vrot.slane %v83_v35, %v87_v33  ;;  %v82_v38 = vadd.f32 %v191_v29, %v73_v36 }
  0xbe   :  { %90 = vbcast.lane.b32.xlu1 %v88_v37, 256  ;;  %v84_v39 = vmax.f32 %v82_v38, 0.0 }
  0xc0   :  { %v95_v40 = vrot.slane %v84_v39, %v87_v33 }
  0xc2   :  { %97 = vbcast.lane.b32.xlu1 %v95_v40, 256 }
 0x130   :  { %v91_v42 = vpop.permute.xlu1 %90 }
 0x131   :  { %v100_v43 = vmul.f32 %v99_v41, %v91_v42 }
 0x133   :  { %v103_v44 = vsel %vm102_vm2, %v100_v43, 0.0 }
 0x134   :  { %v104_v45 = vrot.slane %v103_v44, 4  ;;  %v98_v46 = vpop.permute.xlu1 %97 }
 0x135   :  { %v101_v47 = vmul.f32 %v99_v41, %v98_v46 }
 0x136   :  { %v105_v48 = vadd.f32 %v104_v45, %v103_v44 }
 0x137   :  { %v110_v49 = vsel %vm102_vm2, %v101_v47, 0.0 }
 0x138   :  { %v106_v50 = vrot.slane %v105_v48, 2  ;;  %v111_v51 = vrot.slane %v110_v49, 4 }
 0x13a   :  { %v107_v52 = vadd.f32 %v106_v50, %v105_v48  ;;  %v112_v53 = vadd.f32 %v111_v51, %v110_v49 }
 0x13c   :  { %v108_v54 = vrot.slane %v107_v52, 1  ;;  %v113_v55 = vrot.slane %v112_v53, 2 }
 0x13e   :  { %v109_v57 = vadd.f32 %v108_v54, %v107_v52  ;;  %v114_v58 = vadd.f32 %v113_v55, %v112_v53 }
 0x140   :  { %v124_v59 = vadd.f32 %v192_v56, %v109_v57  ;;  %v115_v60 = vrot.slane %v114_v58, 1 }
 0x142   :  { %v126_v61 = vsub.f32 0.0, %v124_v59  ;;  %v116_v62 = vadd.f32 %v115_v60, %v114_v58 }
 0x144   :  { %v128_v63 = vmul.f32 1.442695, %v126_v61  ;;  %v125_v2 = vadd.f32 %v192_v56, %v116_v62 }
 0x146   :  { %200 = vpow2.f32 %v128_v63  ;;  %v127_v3 = vsub.f32 0.0, %v125_v2 }
 0x148   :  { %v130_v4 = vmul.f32 1.442695, %v127_v3 }
 0x14a   :  { %202 = vpow2.f32 %v130_v4 }
 0x150   :  { %v201_v5 = vpop.eup %200 }
 0x151   :  { %v132_v6 = vadd.f32 1.0, %v201_v5 }
 0x153   :  { %204 = vrcp.f32 %v132_v6 }
 0x154   :  { %v203_v7 = vpop.eup %202 }
 0x155   :  { %v133_v8 = vadd.f32 1.0, %v203_v7 }
 0x157   :  { %206 = vrcp.f32 %v133_v8 }
 0x15d   :  { %v205_v9 = vpop.eup %204 }
 0x15e   :  { %v141_v10 = vrot.slane %v205_v9, %v87_v33 }
 0x160   :  { %143 = vbcast.lane.b32.xlu0 %v141_v10, 256 }
 0x161   :  { %v207_v11 = vpop.eup %206 }
 0x162   :  { %v148_v12 = vrot.slane %v207_v11, %v87_v33 }
 0x164   :  { %150 = vbcast.lane.b32.xlu1 %v148_v12, 256 }
 0x1d2   :  { %v144_v17 = vpop.permute.xlu0 %143 }
 0x1d3   :  { %v160_v18 = vrot.slane %v144_v17, %v159_v16 }
 0x1d5   :  { %v170_v19 = vmul.f32 %v160_v18, %v306_v0 }
 0x1d6   :  { %v151_v20 = vpop.permute.xlu1 %150 }
 0x1d7   :  { %172 = vst [vmem:[#allocation5] sm:$0xff] %v170_v19  ;;  %v167_v21 = vrot.slane %v151_v20, %v159_v16 }
 0x1d9   :  { %v171_v22 = vmul.f32 %v167_v21, %v308_v1 }
 0x1db   :  { %173 = vst [vmem:[#allocation5 + $0x8] sm:$0xff] %v171_v22 }
 0x1dc   :  { %241 = shalt.err (!%p238_p12)
}
 0x1dd   :  { %s242_s15 = scalar_lea.hbm %s350_s5, 256 }
 0x1de   :  { %p243_p13 = scmp.ne.s32.totalorder %s350_s5, %s242_s15  ;;  %p246_p0 = scmp.lt.u32.totalorder %s242_s15, %s350_s5 }
 0x1e0   :  { %p248_p1 = pnand %p246_p0, %p243_p13 }
 0x1e2   :  { %251 = shalt.err (!%p248_p1)
}
 0x1e3   :  { %185 = dma.vmem_to_hbm [thread:$0]  %s180_s4, 256, %s350_s5, [#allocation4], %s257_s28, %s257_s28, %s258_s29  }
 0x1e4   :  { %254 = dma.done.wait [#allocation4], 256  }
 0x1e5   :  { %255 = vsyncadd [#allocation4], 4294967040 }
 0x1e6   :  { %189 = vsyncpa [#allocation3], 1 }
 0x1e7   :  { %190 = vsyncpa [#allocation4], 1 }

</bundles_post_ra>
